<compile_context>
chip_gen: v5e
topology: v5e:2x2
jax: 0.10.0
libtpu: 0.0.40
codegen_flags: <defaults>
</compile_context>

<pallas_src>
import functools
import math

import numpy as np

import jax
import jax.numpy as jnp
from jax import lax
from jax.experimental import pallas as pl
from jax.experimental.pallas import tpu as pltpu

_EPS = 1e-12  # matches torch.nn.functional.normalize default eps


def _hard_shrink_ref(w, lam):
    # MemAE-style hard shrinkage (the `hard_shrink` callable of the module):
    # relu(w - lam) * w / (|w - lam| + eps)
    return (jnp.maximum(w - lam, 0.0) * w) / (jnp.abs(w - lam) + _EPS)


def _memory_unit_kernel(feat_ref, mem_ref, mem_n_ref, mf_ref, w_ref, *,
                        shrink_lambda):
    """One tile of rows: full MemoryUnit forward.

    feat_ref  : (TR, C) tile of flattened features (input dtype)
    mem_ref   : (M,  C) raw memory bank (matmul dtype), resident across grid
    mem_n_ref : (M,  C) L2-normalized memory bank (matmul dtype), resident
    mf_ref    : (TR, C) output memory_feature tile
    w_ref     : (TR, M) output attention-weight tile
    """
    feat = feat_ref[...].astype(jnp.float32)

    # F.normalize(p=2, dim=1): x / max(||x||, eps) == x * rsqrt(max(||x||^2, eps^2))
    inv_norm = lax.rsqrt(
        jnp.maximum(jnp.sum(feat * feat, axis=1, keepdims=True), _EPS * _EPS))
    feat_n = (feat * inv_norm).astype(mem_n_ref.dtype)

    # weight = F.linear(normalized_feature, normalized_memory)  -> (TR, M)
    # Contract the last dims of both operands: no transpose of the bank.
    logits = lax.dot_general(
        feat_n, mem_n_ref[...],
        dimension_numbers=(((1,), (1,)), ((), ())),
        preferred_element_type=jnp.float32)

    # softmax over memory slots (dim=1)
    logits = logits - jnp.max(logits, axis=1, keepdims=True)
    p = jnp.exp(logits)
    w = p * pl.reciprocal(jnp.sum(p, axis=1, keepdims=True), approx=True)

    # hard shrinkage: relu(w - lam) * w / (|w - lam| + eps)
    shifted = w - shrink_lambda
    w = (jnp.maximum(shifted, 0.0) * w) * pl.reciprocal(
        jnp.abs(shifted) + _EPS, approx=True)

    # F.normalize(p=1, dim=1): x / max(||x||_1, eps)
    w = w * pl.reciprocal(
        jnp.maximum(jnp.sum(jnp.abs(w), axis=1, keepdims=True), _EPS),
        approx=True)

    # memory_feature = weight @ memory  -> (TR, C)
    mf = jnp.dot(w.astype(mem_ref.dtype), mem_ref[...],
                 preferred_element_type=jnp.float32)

    mf_ref[...] = mf.astype(mf_ref.dtype)
    w_ref[...] = w.astype(w_ref.dtype)


def memory_unit_forward(feature, memory, shrink_lambda, *, row_tile=512,
                        matmul_dtype=jnp.bfloat16, weight_dtype=jnp.float32):
    """JAX/Pallas equivalent of MemoryUnit.forward.

    feature : any shape with channel at dim 1 (e.g. NCHW); row-major reshaped
              to (-1, channel), exactly like torch .view(-1, C).
    memory  : (memory_size, channel) parameter.
    Returns (memory_feature with feature.shape, weight of shape (rows, M)).
    """
    channel = feature.shape[1]
    memory_size = memory.shape[0]
    flat = jnp.reshape(feature, (-1, channel))
    rows = flat.shape[0]

    tr = min(row_tile, rows)
    grid = (pl.cdiv(rows, tr),)

    # Hoisted, computed once outside the kernel: L2-normalized bank; both bank
    # copies cast to the MXU input dtype.
    mem_f32 = memory.astype(jnp.float32)
    mem_n = mem_f32 / jnp.maximum(
        jnp.linalg.norm(mem_f32, axis=1, keepdims=True), _EPS)
    mem_mm = mem_f32.astype(matmul_dtype)
    mem_n_mm = mem_n.astype(matmul_dtype)

    kernel = functools.partial(_memory_unit_kernel,
                               shrink_lambda=float(shrink_lambda))

    # Rough double-buffered VMEM budget; only ever raises the scoped limit,
    # capped well below v7x's 64 MiB physical VMEM.
    isz = lambda dt: int(np.dtype(dt).itemsize)
    est = 2 * tr * (channel * isz(feature.dtype)            # feature in
                    + channel * isz(feature.dtype)          # memory_feature out
                    + memory_size * isz(weight_dtype))      # weight out
    est += 2 * 2 * memory_size * channel * isz(matmul_dtype)  # resident banks
    est += 12 * tr * memory_size                             # f32 intermediates slack
    vmem_limit = int(min(max(est * 3 // 2, 32 * 1024 * 1024),
                         100 * 1024 * 1024))

    mem_feat_flat, weight = pl.pallas_call(
        kernel,
        out_shape=(
            jax.ShapeDtypeStruct((rows, channel), feature.dtype),
            jax.ShapeDtypeStruct((rows, memory_size), weight_dtype),
        ),
        grid_spec=pltpu.PrefetchScalarGridSpec(
            num_scalar_prefetch=0,
            grid=grid,
            in_specs=[
                pl.BlockSpec((tr, channel), lambda i: (i, 0)),
                # Constant-index bank blocks: fetched once, stay resident.
                # NOTE: pipeline_mode=pl.Buffered(1) would single-buffer them
                # and return M*C bytes of VMEM; left at default for portability.
                pl.BlockSpec((memory_size, channel), lambda i: (0, 0)),
                pl.BlockSpec((memory_size, channel), lambda i: (0, 0)),
            ],
            out_specs=[
                pl.BlockSpec((tr, channel), lambda i: (i, 0)),
                pl.BlockSpec((tr, memory_size), lambda i: (i, 0)),
            ],
        ),
        compiler_params=pltpu.CompilerParams(
            dimension_semantics=("parallel",),
            vmem_limit_bytes=vmem_limit),
    )(flat, mem_mm, mem_n_mm)

    mem_feat = jnp.reshape(mem_feat_flat, feature.shape)
    return mem_feat, weight


def _reference(feature, memory, shrink_lambda):
    # Pure-fp32 reference with the exact PyTorch-module semantics.
    channel = feature.shape[1]
    flat = jnp.reshape(feature, (-1, channel)).astype(jnp.float32)
    mem = memory.astype(jnp.float32)
    fn = flat / jnp.maximum(jnp.linalg.norm(flat, axis=1, keepdims=True), _EPS)
    mn = mem / jnp.maximum(jnp.linalg.norm(mem, axis=1, keepdims=True), _EPS)
    w = jax.nn.softmax(fn @ mn.T, axis=1)
    w = _hard_shrink_ref(w, shrink_lambda)
    w = w / jnp.maximum(jnp.sum(jnp.abs(w), axis=1, keepdims=True), _EPS)
    mf = (w @ mem).reshape(feature.shape)
    return mf, w


if __name__ == "__main__":
    key = jax.random.PRNGKey(0)
    k_feat, k_mem = jax.random.split(key)

    # Small shapes consistent with the module's forward (NCHW feature).
    batch, channel, spatial = 2, 4, 16
    memory_size = 16
    shrink_lambda = 0.0025  # MemAE-style shrink threshold (user-supplied callable param)

    feature = jax.random.normal(k_feat, (batch, channel, spatial, spatial),
                                dtype=jnp.float32)
    # nn.Parameter(torch.Tensor(M, C)).uniform_(-stdv, stdv), stdv = 1/sqrt(C)
    stdv = 1.0 / math.sqrt(channel)
    memory = jax.random.uniform(k_mem, (memory_size, channel),
                                minval=-stdv, maxval=stdv, dtype=jnp.float32)

    # Small row_tile so the demo exercises a multi-step grid (rows=512 -> 4 steps).
    mem_feat, weight = memory_unit_forward(feature, memory, shrink_lambda,
                                           row_tile=128)
    jax.block_until_ready((mem_feat, weight))

    ref_mf, ref_w = _reference(feature, memory, shrink_lambda)
    assert mem_feat.shape == feature.shape
    assert weight.shape == (feature.size // channel, memory_size)
    # bf16 MXU inputs + approximate reciprocals vs. pure-fp32 reference:
    # observed error is O(1e-3); tolerance leaves ample margin.
    assert jnp.allclose(mem_feat, ref_mf, atol=1e-2, rtol=1e-2), float(
        jnp.max(jnp.abs(mem_feat - ref_mf)))
    assert jnp.allclose(weight, ref_w, atol=1e-2, rtol=1e-2), float(
        jnp.max(jnp.abs(weight - ref_w)))

    print("KERNEL_OK")
</pallas_src>

<mosaic_0001>
module attributes {stable_mosaic.version = 11 : i64} {
  func.func @_memory_unit_kernel(%arg0: i32, %arg1: memref<128x4xf32, #tpu.memory_space<vmem>>, %arg2: memref<16x4xbf16, #tpu.memory_space<vmem>>, %arg3: memref<16x4xbf16, #tpu.memory_space<vmem>>, %arg4: memref<128x4xf32, #tpu.memory_space<vmem>>, %arg5: memref<128x16xf32, #tpu.memory_space<vmem>>) attributes {dimension_semantics = [#tpu.dimension_semantics<parallel>], iteration_bounds = array<i64: 4>, scalar_prefetch = 0 : i64, scratch_operands = 0 : i64, tpu.core_type = #tpu.core_type<tc>, window_params = [{transform_indices = @transform_0, window_bounds = array<i64: 128, 4>}, {pipeline_mode = #tpu.pipeline_mode<synchronous>, transform_indices = @transform_1, window_bounds = array<i64: 16, 4>}, {pipeline_mode = #tpu.pipeline_mode<synchronous>, transform_indices = @transform_2, window_bounds = array<i64: 16, 4>}, {transform_indices = @transform_3, window_bounds = array<i64: 128, 4>}, {transform_indices = @transform_4, window_bounds = array<i64: 128, 16>}]} {
    %c0 = arith.constant 0 : index
    %c0_0 = arith.constant 0 : index
    %0 = vector.load %arg1[%c0, %c0_0] : memref<128x4xf32, #tpu.memory_space<vmem>>, vector<128x4xf32>
    %1 = arith.mulf %0, %0 : vector<128x4xf32>
    %cst = arith.constant dense<0.000000e+00> : vector<128xf32>
    %2 = vector.multi_reduction <add>, %1, %cst [1] : vector<128x4xf32> to vector<128xf32>
    %3 = vector.shape_cast %2 : vector<128xf32> to vector<128x1xf32>
    %cst_1 = arith.constant 1.000000e-24 : f32
    %4 = vector.broadcast %cst_1 : f32 to vector<128x1xf32>
    %5 = arith.maximumf %3, %4 : vector<128x1xf32>
    %6 = math.rsqrt %5 : vector<128x1xf32>
    %7 = vector.broadcast %6 : vector<128x1xf32> to vector<128x4xf32>
    %8 = arith.mulf %0, %7 : vector<128x4xf32>
    %9 = arith.truncf %8 : vector<128x4xf32> to vector<128x4xbf16>
    %c0_2 = arith.constant 0 : index
    %c0_3 = arith.constant 0 : index
    %10 = vector.load %arg3[%c0_2, %c0_3] : memref<16x4xbf16, #tpu.memory_space<vmem>>, vector<16x4xbf16>
    %cst_4 = arith.constant dense<0.000000e+00> : vector<128x16xf32>
    %11 = tpu.matmul %9, %10, %cst_4 {dimension_numbers = #tpu.dot_dimension_numbers<[1], [1], [0], [0], [0, 0, 1, 0], [], []>} : vector<128x4xbf16>, vector<16x4xbf16>, vector<128x16xf32> -> vector<128x16xf32>
    %cst_5 = arith.constant dense<0xFF800000> : vector<128xf32>
    %12 = vector.multi_reduction <maximumf>, %11, %cst_5 [1] : vector<128x16xf32> to vector<128xf32>
    %13 = vector.shape_cast %12 : vector<128xf32> to vector<128x1xf32>
    %14 = vector.broadcast %13 : vector<128x1xf32> to vector<128x16xf32>
    %15 = arith.subf %11, %14 : vector<128x16xf32>
    %16 = math.exp %15 : vector<128x16xf32>
    %cst_6 = arith.constant dense<0.000000e+00> : vector<128xf32>
    %17 = vector.multi_reduction <add>, %16, %cst_6 [1] : vector<128x16xf32> to vector<128xf32>
    %18 = vector.shape_cast %17 : vector<128xf32> to vector<128x1xf32>
    %19 = tpu.reciprocal %18 {approx = true} : vector<128x1xf32> -> vector<128x1xf32>
    %20 = vector.broadcast %19 : vector<128x1xf32> to vector<128x16xf32>
    %21 = arith.mulf %16, %20 : vector<128x16xf32>
    %cst_7 = arith.constant 2.500000e-03 : f32
    %22 = vector.broadcast %cst_7 : f32 to vector<128x16xf32>
    %23 = arith.subf %21, %22 : vector<128x16xf32>
    %cst_8 = arith.constant 0.000000e+00 : f32
    %24 = vector.broadcast %cst_8 : f32 to vector<128x16xf32>
    %25 = arith.maximumf %23, %24 : vector<128x16xf32>
    %26 = arith.mulf %25, %21 : vector<128x16xf32>
    %27 = math.absf %23 : vector<128x16xf32>
    %cst_9 = arith.constant 9.99999996E-13 : f32
    %28 = vector.broadcast %cst_9 : f32 to vector<128x16xf32>
    %29 = arith.addf %27, %28 : vector<128x16xf32>
    %30 = tpu.reciprocal %29 {approx = true} : vector<128x16xf32> -> vector<128x16xf32>
    %31 = arith.mulf %26, %30 : vector<128x16xf32>
    %32 = math.absf %31 : vector<128x16xf32>
    %cst_10 = arith.constant dense<0.000000e+00> : vector<128xf32>
    %33 = vector.multi_reduction <add>, %32, %cst_10 [1] : vector<128x16xf32> to vector<128xf32>
    %34 = vector.shape_cast %33 : vector<128xf32> to vector<128x1xf32>
    %cst_11 = arith.constant 9.99999996E-13 : f32
    %35 = vector.broadcast %cst_11 : f32 to vector<128x1xf32>
    %36 = arith.maximumf %34, %35 : vector<128x1xf32>
    %37 = tpu.reciprocal %36 {approx = true} : vector<128x1xf32> -> vector<128x1xf32>
    %38 = vector.broadcast %37 : vector<128x1xf32> to vector<128x16xf32>
    %39 = arith.mulf %31, %38 : vector<128x16xf32>
    %40 = arith.truncf %39 : vector<128x16xf32> to vector<128x16xbf16>
    %c0_12 = arith.constant 0 : index
    %c0_13 = arith.constant 0 : index
    %41 = vector.load %arg2[%c0_12, %c0_13] : memref<16x4xbf16, #tpu.memory_space<vmem>>, vector<16x4xbf16>
    %cst_14 = arith.constant dense<0.000000e+00> : vector<128x4xf32>
    %42 = tpu.matmul %40, %41, %cst_14 {dimension_numbers = #tpu.dot_dimension_numbers<[1], [0], [0], [1], [0, 0, 1, 1], [], []>} : vector<128x16xbf16>, vector<16x4xbf16>, vector<128x4xf32> -> vector<128x4xf32>
    %c0_15 = arith.constant 0 : index
    %c0_16 = arith.constant 0 : index
    %43 = vector.load %arg4[%c0_15, %c0_16] : memref<128x4xf32, #tpu.memory_space<vmem>>, vector<128x4xf32>
    tpu.vector_store %arg4[%c0_15, %c0_16], %42 {strides = array<i32>} : memref<128x4xf32, #tpu.memory_space<vmem>>, vector<128x4xf32>,
    %c0_17 = arith.constant 0 : index
    %c0_18 = arith.constant 0 : index
    %44 = vector.load %arg5[%c0_17, %c0_18] : memref<128x16xf32, #tpu.memory_space<vmem>>, vector<128x16xf32>
    tpu.vector_store %arg5[%c0_17, %c0_18], %39 {strides = array<i32>} : memref<128x16xf32, #tpu.memory_space<vmem>>, vector<128x16xf32>,
    return
  }
  func.func @transform_0(%arg0: i32) -> (i32, i32) {
    %c0_i32 = arith.constant 0 : i32
    %c0_i32_0 = arith.constant 0 : i32
    return %arg0, %c0_i32 : i32, i32
  }
  func.func @transform_1(%arg0: i32) -> (i32, i32) {
    %c0_i32 = arith.constant 0 : i32
    %c0_i32_0 = arith.constant 0 : i32
    %c0_i32_1 = arith.constant 0 : i32
    return %c0_i32, %c0_i32_0 : i32, i32
  }
  func.func @transform_2(%arg0: i32) -> (i32, i32) {
    %c0_i32 = arith.constant 0 : i32
    %c0_i32_0 = arith.constant 0 : i32
    %c0_i32_1 = arith.constant 0 : i32
    return %c0_i32, %c0_i32_0 : i32, i32
  }
  func.func @transform_3(%arg0: i32) -> (i32, i32) {
    %c0_i32 = arith.constant 0 : i32
    %c0_i32_0 = arith.constant 0 : i32
    return %arg0, %c0_i32 : i32, i32
  }
  func.func @transform_4(%arg0: i32) -> (i32, i32) {
    %c0_i32 = arith.constant 0 : i32
    %c0_i32_0 = arith.constant 0 : i32
    return %arg0, %c0_i32 : i32, i32
  }
}

</mosaic_0001>

<bundles_post_ra>
// kernel: tpu_custom_call.1
= control target key start
LH: loop header
LB: loop body
LE: loop exit
PB: predicated region body
PF: predicated region fallthrough
CT: control target
= control target key end

     0   :  { %s1450_s15 = smov 0   ;;  %s2167_s0 = inlined_call_operand.vmem [shape: f32[512,4], index: 0, kind: input, shape index: {}]   ;;  %s2168_s1 = inlined_call_operand.vmem [shape: bf16[16,4], index: 1, kind: input, shape index: {}]   ;;  %s2169_s2 = inlined_call_operand.vmem [shape: bf16[16,4], index: 2, kind: input, shape index: {}]   ;;  %s2170_s3 = inlined_call_operand.vmem [shape: f32[512,4], index: 3, kind: output, shape index: {0}]   ;;  %s2171_s4 = inlined_call_operand.vmem [shape: f32[512,16], index: 4, kind: output, shape index: {1}]  }
   0x1 LB: > { %s1192_s16 = sadd.s32 4294967295, %s1423_s15   ;;  %p1196_p0 = scmp.ge.s32.totalorder %s1423_s15, 1  ;;  %s1423_s15 = sphi %s1450_s15, %s15_s15  }
   0x2   : > { %p166_p1 = scmp.lt.s32.totalorder %s1423_s15, 5 }
   0x4   : > { %p167_p2 = pnand %p1196_p0, %p166_p1 }
   0x5   : > { %s1197_s17 = sshll.u32 (!%p167_p2), %s1192_s16, 4 }
   0x6   : > { %170 = sbr.rel (%p167_p2) target bundleno = 973 (0x3cd), region = 32  ;;  %p198_p3 = scmp.lt.s32.totalorder (!%p167_p2), %s1197_s17, 63 }
   0xb   : > { %s2195_s17 = smov (!%p198_p3, %s1197_s17), 63  ;;  %vm248_vm0 = vcmask 31744   ;;  %v1245_v48 = vld [vmem:[%s2169_s2] sm:$0xff] }
   0xc   : > { %s1458_s18 = sshll.u32 %s2195_s17, 3  ;;  %v529_v49 = vsel %vm248_vm0, %v1245_v48, 0 }
   0xd   : > { %s1464_s21 = scalar_lea.vmem %s2167_s0, %s1458_s18  ;;  %538 = vmatpush.bf16.xpose.msra.mxu0 %v529_v49  ;;  %1247 = vmatpush.bf16.xpose.msra.mxu2 %v529_v49  ;;  %s2060_s28 = scalar_lea.vmem %s2171_s4, %s1458_s18 }
   0xe   : > { %v1467_v0 = vld [vmem:[%s1464_s21 + $0x40] sm:$0xff]  ;;  %v1477_v4 = vld [vmem:[%s1464_s21 + $0x10] sm:$0xff]  ;;  %v1480_v5 = vld [vmem:[%s1464_s21 + $0x48] sm:$0xff]  ;;  %s2122_s5 = scalar_lea.vmem %s2170_s3, %s1458_s18 }
   0xf   : > { %v1470_v1 = vld [vmem:[%s1464_s21] sm:$0xff]  ;;  %v240_v2 = vmul.f32 %v1467_v0, %v1467_v0  ;;  %v1483_v6 = vld [vmem:[%s1464_s21 + $0x8] sm:$0xff]  ;;  %v234_v7 = vmul.f32 %v1477_v4, %v1477_v4  ;;  %v1490_v10 = vld [vmem:[%s1464_s21 + $0x18] sm:$0xff]  ;;  %v241_v12 = vmul.f32 %v1480_v5, %v1480_v5 }
  0x10   : > { %v232_v3 = vmul.f32 %v1470_v1, %v1470_v1  ;;  %v233_v13 = vmul.f32 %v1483_v6, %v1483_v6  ;;  %v235_v14 = vmul.f32 %v1490_v10, %v1490_v10  ;;  %v1502_v17 = vld [vmem:[%s1464_s21 + $0x58] sm:$0xff]  ;;  %v1506_v19 = vld [vmem:[%s1464_s21 + $0x50] sm:$0xff]  ;;  %v1509_v20 = vld [vmem:[%s1464_s21 + $0x20] sm:$0xff] }
  0x11   : > { %v273_v8 = vsel %vm248_vm0, %v240_v2, 0.0  ;;  %v255_v11 = vsel %vm248_vm0, %v234_v7, 0.0  ;;  %v276_v15 = vsel %vm248_vm0, %v241_v12, 0.0  ;;  %v243_v21 = vmul.f32 %v1502_v17, %v1502_v17  ;;  %v1521_v27 = vld [vmem:[%s1464_s21 + $0x60] sm:$0xff]  ;;  %v1524_v28 = vld [vmem:[%s1464_s21 + $0x28] sm:$0xff]  ;;  %v1539_v36 = vld [vmem:[%s1464_s21 + $0x38] sm:$0xff] }
  0x12   : > { %v249_v9 = vsel %vm248_vm0, %v232_v3, 0.0  ;;  %274 = vadd.xlane.f32.xlu1 %v273_v8  ;;  %256 = vadd.xlane.f32.xlu2 %v255_v11  ;;  %v252_v16 = vsel %vm248_vm0, %v233_v13, 0.0  ;;  %v258_v18 = vsel %vm248_vm0, %v235_v14, 0.0  ;;  %v242_v22 = vmul.f32 %v1506_v19, %v1506_v19  ;;  %v1527_v29 = vld [vmem:[%s1464_s21 + $0x68] sm:$0xff]  ;;  %v1542_v37 = vld [vmem:[%s1464_s21 + $0x30] sm:$0xff]  ;;  %v1557_v45 = vld [vmem:[%s1464_s21 + $0x78] sm:$0xff] }
  0x13   : > { %250 = vadd.xlane.f32.xlu0 %v249_v9  ;;  %v236_v23 = vmul.f32 %v1509_v20, %v1509_v20  ;;  %v282_v24 = vsel %vm248_vm0, %v243_v21, 0.0  ;;  %v244_v30 = vmul.f32 %v1521_v27, %v1521_v27  ;;  %v237_v31 = vmul.f32 %v1524_v28, %v1524_v28  ;;  %v1545_v38 = vld [vmem:[%s1464_s21 + $0x70] sm:$0xff] }
  0x14   : > { %v279_v25 = vsel %vm248_vm0, %v242_v22, 0.0  ;;  %v245_v32 = vmul.f32 %v1527_v29, %v1527_v29  ;;  %v239_v39 = vmul.f32 %v1539_v36, %v1539_v36  ;;  %v238_v40 = vmul.f32 %v1542_v37, %v1542_v37 }
  0x15   : > { %v261_v26 = vsel %vm248_vm0, %v236_v23, 0.0  ;;  %v285_v33 = vsel %vm248_vm0, %v244_v30, 0.0  ;;  %v264_v34 = vsel %vm248_vm0, %v237_v31, 0.0  ;;  %v246_v41 = vmul.f32 %v1545_v38, %v1545_v38 }
  0x16   : > { %v288_v35 = vsel %vm248_vm0, %v245_v32, 0.0  ;;  %v270_v42 = vsel %vm248_vm0, %v239_v39, 0.0  ;;  %v267_v43 = vsel %vm248_vm0, %v238_v40, 0.0  ;;  %v247_v46 = vmul.f32 %v1557_v45, %v1557_v45 }
  0x17   : > { %v291_v44 = vsel %vm248_vm0, %v246_v41, 0.0 }
  0x18   : > { %v294_v47 = vsel %vm248_vm0, %v247_v46, 0.0 }
  0x1a   : > { %277 = vadd.xlane.f32.xlu1 %v276_v15  ;;  %259 = vadd.xlane.f32.xlu2 %v258_v18 }
  0x1b   : > { %253 = vadd.xlane.f32.xlu0 %v252_v16 }
  0x22   : > { %283 = vadd.xlane.f32.xlu1 %v282_v24  ;;  %262 = vadd.xlane.f32.xlu2 %v261_v26 }
  0x23   : > { %280 = vadd.xlane.f32.xlu0 %v279_v25 }
  0x2a   : > { %286 = vadd.xlane.f32.xlu1 %v285_v33  ;;  %289 = vadd.xlane.f32.xlu2 %v288_v35 }
  0x2b   : > { %265 = vadd.xlane.f32.xlu0 %v264_v34 }
  0x32   : > { %271 = vadd.xlane.f32.xlu1 %v270_v42  ;;  %292 = vadd.xlane.f32.xlu2 %v291_v44 }
  0x33   : > { %268 = vadd.xlane.f32.xlu0 %v267_v43 }
  0x3b   : > { %295 = vadd.xlane.f32.xlu0 %v294_v47 }
  0x85   : > { %v275_v50 = vpop.xlane.xlu1 %274  ;;  %v257_v54 = vpop.xlane.xlu2 %256 }
  0x86   : > { %v251_v51 = vpop.xlane.xlu0 %250  ;;  %v305_v52 = vmax.f32 %v275_v50, 1e-24  ;;  %v1566_v55 = vmax.f32 %v257_v54, 1e-24 }
  0x87   : > { %v297_v53 = vmax.f32 %v251_v51, 1e-24 }
  0x88   : > { %1257 = vrsqrt.f32 %v305_v52  ;;  %vm399_vm1 = vweird.f32 %v305_v52  ;;  %vm339_vm8 = vweird.f32 %v1566_v55 }
  0x89   : > { %1259 = vrsqrt.f32 %v297_v53  ;;  %vm319_vm2 = vweird.f32 %v297_v53 }
  0x8a   : > { %1261 = vrsqrt.f32 %v1566_v55 }
  0x8d   : > { %v278_v56 = vpop.xlane.xlu1 %277  ;;  %v260_v61 = vpop.xlane.xlu2 %259 }
  0x8e   : > { %v254_v57 = vpop.xlane.xlu0 %253  ;;  %v1569_v58 = vpop.eup %1257  ;;  %v1571_v59 = vmax.f32 %v278_v56, 1e-24  ;;  %v1578_v2 = vmax.f32 %v260_v61, 1e-24 }
  0x8f   : > { %v1573_v60 = vmax.f32 %v254_v57, 1e-24  ;;  %v1575_v62 = vpop.eup %1259  ;;  %v394_v63 = vmul.f32 %v1569_v58, %v305_v52  ;;  %vm400_vm3 = vweird.f32 %v1569_v58 }
  0x90   : > { %v1580_v3 = vpop.eup %1261  ;;  %v314_v7 = vmul.f32 %v1575_v62, %v297_v53  ;;  %1263 = vrsqrt.f32 %v1571_v59  ;;  %vm320_vm4 = vweird.f32 %v1575_v62  ;;  %vm409_vm5 = vweird.f32 %v1571_v59  ;;  %vm1618_vm7 = vmor %vm399_vm1, %vm400_vm3 }
  0x91   : > { %v395_v8 = vmul.f32 %v1569_v58, %v394_v63  ;;  %1265 = vrsqrt.f32 %v1573_v60  ;;  %v334_v12 = vmul.f32 %v1580_v3, %v1566_v55  ;;  %vm329_vm6 = vweird.f32 %v1573_v60  ;;  %vm1629_vm9 = vmor %vm319_vm2, %vm320_vm4 }
  0x92   : > { %v315_v9 = vmul.f32 %v1575_v62, %v314_v7  ;;  %1267 = vrsqrt.f32 %v1578_v2  ;;  %vm340_vm11 = vweird.f32 %v1580_v3  ;;  %vm349_vm12 = vweird.f32 %v1578_v2 }
  0x93   : > { %v396_v11 = vmul.f32 0.5, %v395_v8  ;;  %v335_v30 = vmul.f32 %v1580_v3, %v334_v12  ;;  %vm1699_vm4 = vmor %vm339_vm8, %vm340_vm11 }
  0x94   : > { %v316_v13 = vmul.f32 0.5, %v315_v9 }
  0x95   : > { %v284_v14 = vpop.xlane.xlu1 %283  ;;  %v397_v18 = vsub.f32 1.5, %v396_v11  ;;  %v263_v24 = vpop.xlane.xlu2 %262  ;;  %v336_v43 = vmul.f32 0.5, %v335_v30 }
  0x96   : > { %v281_v15 = vpop.xlane.xlu0 %280  ;;  %v1590_v16 = vpop.eup %1263  ;;  %v317_v21 = vsub.f32 1.5, %v316_v13  ;;  %v1592_v22 = vmax.f32 %v284_v14, 1e-24  ;;  %v1624_v46 = vmax.f32 %v263_v24, 1e-24 }
  0x97   : > { %v1594_v23 = vmax.f32 %v281_v15, 1e-24  ;;  %v1596_v25 = vpop.eup %1265  ;;  %v404_v26 = vmul.f32 %v1590_v16, %v1571_v59  ;;  %v398_v39 = vmul.f32 %v1569_v58, %v397_v18  ;;  %vm410_vm10 = vweird.f32 %v1590_v16 }
  0x98   : > { %v1601_v31 = vpop.eup %1267  ;;  %v324_v32 = vmul.f32 %v1596_v25, %v1573_v60  ;;  %1269 = vrsqrt.f32 %v1592_v22  ;;  %v318_v33 = vmul.f32 %v1575_v62, %v317_v21  ;;  %vm330_vm13 = vweird.f32 %v1596_v25  ;;  %vm1653_vm14 = vmor %vm409_vm5, %vm410_vm10 }
  0x99   : > { %v405_v34 = vmul.f32 %v1590_v16, %v404_v26  ;;  %v344_v35 = vmul.f32 %v1601_v31, %v1578_v2  ;;  %1271 = vrsqrt.f32 %v1594_v23  ;;  %v402_v57 = vsel %vm1618_vm7, %v1569_v58, %v398_v39  ;;  %vm331_vm1 = vmor %vm329_vm6, %vm330_vm13 }
  0x9a   : > { %v325_v40 = vmul.f32 %v1596_v25, %v324_v32  ;;  %1273 = vrsqrt.f32 %v1624_v46  ;;  %v322_v50 = vsel %vm1629_vm9, %v1575_v62, %v318_v33  ;;  %v337_v8 = vsub.f32 1.5, %v336_v43 }
  0x9b   : > { %v406_v42 = vmul.f32 0.5, %v405_v34  ;;  %v345_v44 = vmul.f32 %v1601_v31, %v344_v35  ;;  %vm429_vm15 = vweird.f32 %v1592_v22  ;;  %v473_v15 = vmul.f32 %v322_v50, %v1470_v1 }
  0x9c   : > { %v326_v48 = vmul.f32 0.5, %v325_v40  ;;  %v481_v18 = vmul.f32 %v402_v57, %v1467_v0  ;;  %vm350_vm3 = vweird.f32 %v1601_v31  ;;  %vm419_vm5 = vweird.f32 %v1594_v23 }
  0x9d   : > { %v407_v49 = vsub.f32 1.5, %v406_v42  ;;  %v287_v51 = vpop.xlane.xlu1 %286  ;;  %v346_v56 = vmul.f32 0.5, %v345_v44  ;;  %v290_v63 = vpop.xlane.xlu2 %289  ;;  %vm1708_vm7 = vmor %vm349_vm12, %vm350_vm3  ;;  %vm359_vm10 = vweird.f32 %v1624_v46 }
  0x9e   : > { %v266_v52 = vpop.xlane.xlu0 %265  ;;  %v1641_v53 = vpop.eup %1269  ;;  %v327_v54 = vsub.f32 1.5, %v326_v48  ;;  %v1646_v61 = vmax.f32 %v287_v51, 1e-24  ;;  %v1664_v12 = vmax.f32 %v290_v63, 1e-24 }
  0x9f   : > { %v408_v7 = vmul.f32 %v1590_v16, %v407_v49  ;;  %v424_v9 = vmul.f32 %v1641_v53, %v1592_v22  ;;  %v1660_v58 = vpop.eup %1271  ;;  %v1666_v13 = vmax.f32 %v266_v52, 1e-24  ;;  %v347_v21 = vsub.f32 1.5, %v346_v56 }
  0xa0   : > { %v328_v11 = vmul.f32 %v1596_v25, %v327_v54  ;;  %1275 = vrsqrt.f32 %v1646_v61  ;;  %v414_v14 = vmul.f32 %v1660_v58, %v1594_v23  ;;  %v1682_v60 = vpop.eup %1273  ;;  %vm430_vm2 = vweird.f32 %v1641_v53 }
  0xa1   : > { %v425_v59 = vmul.f32 %v1641_v53, %v424_v9  ;;  %v412_v26 = vsel %vm1653_vm14, %v1590_v16, %v408_v7  ;;  %1277 = vrsqrt.f32 %v1664_v12  ;;  %v354_v0 = vmul.f32 %v1682_v60, %v1624_v46  ;;  %vm1723_vm8 = vmor %vm429_vm15, %vm430_vm2 }
  0xa2   : > { %v332_v24 = vsel %vm331_vm1, %v1596_v25, %v328_v11  ;;  %v415_v32 = vmul.f32 %v1660_v58, %v414_v14  ;;  %v482_v1 = vmul.f32 %v412_v26, %v1480_v5  ;;  %1279 = vrsqrt.f32 %v1666_v13 }
  0xa3   : > { %v426_v30 = vmul.f32 0.5, %v425_v59  ;;  %v474_v33 = vmul.f32 %v332_v24, %v1483_v6  ;;  %v338_v6 = vmul.f32 %v1580_v3, %v337_v8  ;;  %v348_v41 = vmul.f32 %v1601_v31, %v347_v21 }
  0xa4   : > { %v416_v25 = vmul.f32 0.5, %v415_v32  ;;  %v493_v35 = vpack.c.bf16 %v482_v1, %v481_v18  ;;  %vm420_vm6 = vweird.f32 %v1660_v58  ;;  %v355_v50 = vmul.f32 %v1682_v60, %v354_v0 }
  0xa5   : > { %v427_v16 = vsub.f32 1.5, %v426_v30  ;;  %v489_v34 = vpack.c.bf16 %v474_v33, %v473_v15  ;;  %v272_v44 = vpop.xlane.xlu1 %271  ;;  %vm1728_vm9 = vmor %vm419_vm5, %vm420_vm6  ;;  %v342_v22 = vsel %vm1699_vm4, %v1580_v3, %v338_v6  ;;  %v352_v56 = vsel %vm1708_vm7, %v1601_v31, %v348_v41  ;;  %v293_v8 = vpop.xlane.xlu2 %292 }
  0xa6   : > { %v269_v39 = vpop.xlane.xlu0 %268  ;;  %v1692_v40 = vpop.eup %1275  ;;  %v417_v43 = vsub.f32 1.5, %v416_v25  ;;  %1211 = vmatmul.msk.bf16.vlgmr.msra.gmra.mxu2 %vm248_vm0, %v493_v35  ;;  %v1744_v57 = vmax.f32 %v272_v44, 1e-24  ;;  %v356_v11 = vmul.f32 0.5, %v355_v50  ;;  %v475_v59 = vmul.f32 %v342_v22, %v1477_v4 }
  0xa7   : > { %1207 = vmatmul.msk.bf16.vlgmr.msra.gmra.mxu0 %vm248_vm0, %v489_v34  ;;  %v434_v55 = vmul.f32 %v1692_v40, %v1646_v61  ;;  %v1716_v47 = vpop.eup %1277  ;;  %v428_v23 = vmul.f32 %v1641_v53, %v427_v16  ;;  %v1749_v62 = vmax.f32 %v269_v39, 1e-24  ;;  %v476_v14 = vmul.f32 %v352_v56, %v1490_v10 }
  0xa8   : > { %v418_v48 = vmul.f32 %v1660_v58, %v417_v43  ;;  %v444_v51 = vmul.f32 %v1716_v47, %v1664_v12  ;;  %v1735_v52 = vpop.eup %1279  ;;  %1281 = vrsqrt.f32 %v1744_v57  ;;  %v1761_v21 = vmax.f32 %v293_v8, 1e-24 }
  0xa9   : > { %v435_v54 = vmul.f32 %v1692_v40, %v434_v55  ;;  %v364_v7 = vmul.f32 %v1735_v52, %v1666_v13  ;;  %v432_v3 = vsel %vm1723_vm8, %v1641_v53, %v428_v23  ;;  %1283 = vrsqrt.f32 %v1749_v62 }
  0xaa   : > { %v445_v63 = vmul.f32 %v1716_v47, %v444_v51  ;;  %v422_v9 = vsel %vm1728_vm9, %v1660_v58, %v418_v48  ;;  %v484_v53 = vmul.f32 %v432_v3, %v1502_v17  ;;  %1285 = vrsqrt.f32 %v1761_v21 }
  0xab   : > { %v365_v31 = vmul.f32 %v1735_v52, %v364_v7  ;;  %v436_v18 = vmul.f32 0.5, %v435_v54  ;;  %v483_v26 = vmul.f32 %v422_v9, %v1506_v19  ;;  %v357_v4 = vsub.f32 1.5, %v356_v11 }
  0xac   : > { %v446_v58 = vmul.f32 0.5, %v445_v63  ;;  %vm360_vm11 = vweird.f32 %v1682_v60  ;;  %v490_v33 = vpack.c.bf16 %v476_v14, %v475_v59  ;;  %vm439_vm12 = vweird.f32 %v1646_v61 }
  0xad   : > { %v366_v30 = vmul.f32 0.5, %v365_v31  ;;  %v437_v10 = vsub.f32 1.5, %v436_v18  ;;  %v494_v1 = vpack.c.bf16 %v484_v53, %v483_v26  ;;  %vm440_vm13 = vweird.f32 %v1692_v40  ;;  %vm1787_vm1 = vmor %vm359_vm10, %vm360_vm11 }
  0xae   : > { %v296_v15 = vpop.xlane.xlu0 %295  ;;  %v447_v32 = vsub.f32 1.5, %v446_v58  ;;  %v1772_v0 = vpop.eup %1281  ;;  %vm449_vm14 = vweird.f32 %v1664_v12  ;;  %vm450_vm15 = vweird.f32 %v1716_v47  ;;  %v358_v25 = vmul.f32 %v1682_v60, %v357_v4  ;;  %vm1794_vm4 = vmor %vm439_vm12, %vm440_vm13 }
  0xaf   : > { %v1763_v24 = vmax.f32 %v296_v15, 1e-24  ;;  %v367_v17 = vsub.f32 1.5, %v366_v30  ;;  %v1776_v19 = vpop.eup %1283  ;;  %vm369_vm2 = vweird.f32 %v1666_v13  ;;  %vm370_vm3 = vweird.f32 %v1735_v52  ;;  %vm1803_vm5 = vmor %vm449_vm14, %vm450_vm15 }
  0xb0   : > { %v1780_v16 = vpop.eup %1285  ;;  %v438_v61 = vmul.f32 %v1692_v40, %v437_v10  ;;  %v448_v35 = vmul.f32 %v1716_v47, %v447_v32  ;;  %v384_v46 = vmul.f32 %v1772_v0, %v1744_v57  ;;  %v374_v5 = vmul.f32 %v1776_v19, %v1749_v62  ;;  %vm371_vm6 = vmor %vm369_vm2, %vm370_vm3 }
  0xb1   : > { %1287 = vrsqrt.f32 %v1763_v24  ;;  %v368_v6 = vmul.f32 %v1735_v52, %v367_v17  ;;  %v454_v41 = vmul.f32 %v1780_v16, %v1761_v21  ;;  %v362_v55 = vsel %vm1787_vm1, %v1682_v60, %v358_v25 }
  0xb2   : > { %v385_v43 = vmul.f32 %v1772_v0, %v384_v46  ;;  %v442_v44 = vsel %vm1794_vm4, %v1692_v40, %v438_v61  ;;  %v452_v23 = vsel %vm1803_vm5, %v1716_v47, %v448_v35  ;;  %v375_v2 = vmul.f32 %v1776_v19, %v374_v5 }
  0xb3   : > { %v372_v48 = vsel %vm371_vm6, %v1735_v52, %v368_v6  ;;  %v455_v49 = vmul.f32 %v1780_v16, %v454_v41  ;;  %v477_v51 = vmul.f32 %v362_v55, %v1509_v20  ;;  %v485_v60 = vmul.f32 %v442_v44, %v1521_v27 }
  0xb4   : > { %v478_v54 = vmul.f32 %v372_v48, %v1524_v28  ;;  %v486_v22 = vmul.f32 %v452_v23, %v1527_v29  ;;  %v386_v40 = vmul.f32 0.5, %v385_v43  ;;  %v376_v56 = vmul.f32 0.5, %v375_v2 }
  0xb5   : > { %v456_v63 = vmul.f32 0.5, %v455_v49  ;;  %vm389_vm7 = vweird.f32 %v1744_v57  ;;  %vm379_vm8 = vweird.f32 %v1749_v62  ;;  %vm390_vm9 = vweird.f32 %v1772_v0 }
  0xb6   : > { %1212 = vmatmul.msk.bf16.gmra.mxu2 %vm248_vm0, %v494_v1  ;;  %vm380_vm10 = vweird.f32 %v1776_v19  ;;  %v491_v47 = vpack.c.bf16 %v478_v54, %v477_v51  ;;  %v495_v20 = vpack.c.bf16 %v486_v22, %v485_v60  ;;  %v387_v52 = vsub.f32 1.5, %v386_v40  ;;  %vm1836_vm13 = vmor %vm389_vm7, %vm390_vm9 }
  0xb7   : > { %1208 = vmatmul.msk.bf16.gmra.mxu0 %vm248_vm0, %v490_v33  ;;  %v1288_v39 = vpop.eup %1287  ;;  %v377_v28 = vsub.f32 1.5, %v376_v56  ;;  %v457_v8 = vsub.f32 1.5, %v456_v63  ;;  %vm459_vm11 = vweird.f32 %v1761_v21  ;;  %vm460_vm12 = vweird.f32 %v1780_v16  ;;  %vm381_vm1 = vmor %vm379_vm8, %vm380_vm10 }
  0xb8   : > { %v464_v42 = vmul.f32 %v1288_v39, %v1763_v24  ;;  %vm469_vm14 = vweird.f32 %v1763_v24  ;;  %vm470_vm15 = vweird.f32 %v1288_v39  ;;  %v388_v57 = vmul.f32 %v1772_v0, %v387_v52  ;;  %vm461_vm2 = vmor %vm459_vm11, %vm460_vm12 }
  0xb9   : > { %v378_v62 = vmul.f32 %v1776_v19, %v377_v28  ;;  %v458_v9 = vmul.f32 %v1780_v16, %v457_v8  ;;  %vm471_vm3 = vmor %vm469_vm14, %vm470_vm15  ;;  %vm580_vm4 = vcmask 130048  }
  0xba   : > { %v465_v50 = vmul.f32 %v1288_v39, %v464_v42  ;;  %v392_v31 = vsel %vm1836_vm13, %v1772_v0, %v388_v57 }
  0xbb   : > { %v382_v11 = vsel %vm381_vm1, %v1776_v19, %v378_v62  ;;  %v462_v59 = vsel %vm461_vm2, %v1780_v16, %v458_v9  ;;  %v480_v18 = vmul.f32 %v392_v31, %v1539_v36 }
  0xbc   : > { %v466_v7 = vmul.f32 0.5, %v465_v50  ;;  %v479_v15 = vmul.f32 %v382_v11, %v1542_v37  ;;  %v487_v21 = vmul.f32 %v462_v59, %v1545_v38 }
  0xbe   : > { %v467_v27 = vsub.f32 1.5, %v466_v7  ;;  %v492_v58 = vpack.c.bf16 %v480_v18, %v479_v15 }
  0xc0   : > { %v468_v3 = vmul.f32 %v1288_v39, %v467_v27 }
  0xc2   : > { %v472_v14 = vsel %vm471_vm3, %v1288_v39, %v468_v3 }
  0xc3   : > { %v488_v24 = vmul.f32 %v472_v14, %v1557_v45 }
  0xc5   : > { %v496_v26 = vpack.c.bf16 %v488_v24, %v487_v21 }
  0xc6   : > { %1213 = vmatmul.msk.bf16.gmra.mxu2 %vm248_vm0, %v495_v20 }
  0xc7   : > { %1209 = vmatmul.msk.bf16.gmra.mxu0 %vm248_vm0, %v491_v47 }
  0xd6   : > { %1214 = vmatmul.msk.bf16.gmra.mxu2 %vm248_vm0, %v496_v26 }
  0xd7   : > { %1210 = vmatmul.msk.bf16.gmra.mxu0 %vm248_vm0, %v492_v58 }
 0x124   : > { %v540_v53 = vpop.f32.mrf.mxu0 }
 0x125   : > { %v581_v30 = vsel %vm580_vm4, %v540_v53, -inf }
 0x126   : > { %582 = vmax.xlane.f32.xlu1 %v581_v30 }
 0x129   : > { %v1858_v4 = vpop.f32.mrf.mxu2 }
 0x12a   : > { %v605_v62 = vsel %vm580_vm4, %v1858_v4, -inf }
 0x12c   : > { %v542_v37 = vpop.f32.mrf.mxu0 }
 0x12d   : > { %v584_v36 = vsel %vm580_vm4, %v542_v37, -inf }
 0x12e   : > { %585 = vmax.xlane.f32.xlu2 %v584_v36 }
 0x131   : > { %v1861_v38 = vpop.f32.mrf.mxu2 }
 0x132   : > { %v608_v55 = vsel %vm580_vm4, %v1861_v38, -inf }
 0x134   : > { %v545_v45 = vpop.f32.mrf.mxu0 }
 0x135   : > { %v587_v10 = vsel %vm580_vm4, %v545_v45, -inf }
 0x136   : > { %588 = vmax.xlane.f32.xlu0 %v587_v10 }
 0x139   : > { %v565_v32 = vpop.f32.mrf.mxu2 }
 0x13a   : > { %v611_v33 = vsel %vm580_vm4, %v565_v32, -inf }
 0x13b   : > { %612 = vmax.xlane.f32.xlu2 %v611_v33 }
 0x13c   : > { %v547_v1 = vpop.f32.mrf.mxu0 }
 0x13d   : > { %v590_v0 = vsel %vm580_vm4, %v547_v1, -inf }
 0x13e   : > { %591 = vmax.xlane.f32.xlu1 %v590_v0 }
 0x141   : > { %v1866_v17 = vpop.f32.mrf.mxu2 }
 0x142   : > { %v614_v19 = vsel %vm580_vm4, %v1866_v17, -inf }
 0x143   : > { %615 = vmax.xlane.f32.xlu0 %v614_v19 }
 0x144   : > { %v1870_v16 = vpop.f32.mrf.mxu0 }
 0x145   : > { %v593_v25 = vsel %vm580_vm4, %v1870_v16, -inf }
 0x146   : > { %594 = vmax.xlane.f32.xlu1 %v593_v25 }
 0x149   : > { %v1874_v34 = vpop.f32.mrf.mxu2 }
 0x14a   : > { %v617_v61 = vsel %vm580_vm4, %v1874_v34, -inf }
 0x14b   : > { %618 = vmax.xlane.f32.xlu0 %v617_v61 }
 0x14c   : > { %v1878_v12 = vpop.f32.mrf.mxu0 }
 0x14d   : > { %v596_v35 = vsel %vm580_vm4, %v1878_v12, -inf }
 0x14e   : > { %597 = vmax.xlane.f32.xlu2 %v596_v35 }
 0x151   : > { %v1882_v46 = vpop.f32.mrf.mxu2 }
 0x152   : > { %v620_v39 = vsel %vm580_vm4, %v1882_v46, -inf }
 0x153   : > { %621 = vmax.xlane.f32.xlu1 %v620_v39 }
 0x154   : > { %v1886_v13 = vpop.f32.mrf.mxu0 }
 0x155   : > { %v599_v6 = vsel %vm580_vm4, %v1886_v13, -inf }
 0x156   : > { %600 = vmax.xlane.f32.xlu2 %v599_v6 }
 0x159   : > { %v1894_v42 = vpop.f32.mrf.mxu2 }
 0x15a   : > { %v623_v43 = vsel %vm580_vm4, %v1894_v42, -inf }
 0x15c   : > { %v1890_v5 = vpop.f32.mrf.mxu0 }
 0x15d   : > { %v602_v41 = vsel %vm580_vm4, %v1890_v5, -inf }
 0x15e   : > { %603 = vmax.xlane.f32.xlu0 %v602_v41 }
 0x161   : > { %v1904_v22 = vpop.f32.mrf.mxu2 }
 0x162   : > { %v626_v47 = vsel %vm580_vm4, %v1904_v22, -inf }
 0x166   : > { %624 = vmax.xlane.f32.xlu0 %v623_v43 }
 0x16e   : > { %609 = vmax.xlane.f32.xlu0 %v608_v55 }
 0x199   : > { %v583_v44 = vpop.xlane.xlu1 %582 }
 0x19a   : > { %v629_v23 = vsub.f32 %v540_v53, %v583_v44 }
 0x19c   : > { %v645_v2 = vmul.f32 1.442695, %v629_v23 }
 0x19e   : > { %1289 = vpow2.f32 %v645_v2 }
 0x1a1   : > { %v586_v48 = vpop.xlane.xlu2 %585 }
 0x1a2   : > { %v630_v49 = vsub.f32 %v542_v37, %v586_v48 }
 0x1a4   : > { %v1900_v50 = vpop.eup %1289  ;;  %v647_v51 = vmul.f32 1.442695, %v630_v49 }
 0x1a5   : > { %v677_v54 = vsel %vm580_vm4, %v1900_v50, 0.0 }
 0x1a6   : > { %1291 = vpow2.f32 %v647_v51  ;;  %678 = vadd.xlane.f32.xlu1 %v677_v54 }
 0x1a9   : > { %v589_v60 = vpop.xlane.xlu0 %588 }
 0x1aa   : > { %v631_v40 = vsub.f32 %v545_v45, %v589_v60 }
 0x1ac   : > { %v1906_v56 = vpop.eup %1291  ;;  %v649_v63 = vmul.f32 1.442695, %v631_v40 }
 0x1ad   : > { %v680_v7 = vsel %vm580_vm4, %v1906_v56, 0.0 }
 0x1ae   : > { %1293 = vpow2.f32 %v649_v63  ;;  %681 = vadd.xlane.f32.xlu2 %v680_v7  ;;  %627 = vmax.xlane.f32.xlu1 %v626_v47  ;;  %v613_v20 = vpop.xlane.xlu2 %612 }
 0x1af   : > { %v639_v52 = vsub.f32 %v565_v32, %v613_v20 }
 0x1b1   : > { %v592_v28 = vpop.xlane.xlu1 %591  ;;  %v665_v8 = vmul.f32 1.442695, %v639_v52 }
 0x1b2   : > { %v632_v27 = vsub.f32 %v547_v1, %v592_v28 }
 0x1b3   : > { %1295 = vpow2.f32 %v665_v8 }
 0x1b4   : > { %v1912_v29 = vpop.eup %1293  ;;  %v651_v57 = vmul.f32 1.442695, %v632_v27 }
 0x1b5   : > { %v683_v9 = vsel %vm580_vm4, %v1912_v29, 0.0 }
 0x1b6   : > { %1297 = vpow2.f32 %v651_v57  ;;  %606 = vmax.xlane.f32.xlu2 %v605_v62  ;;  %684 = vadd.xlane.f32.xlu1 %v683_v9  ;;  %v616_v3 = vpop.xlane.xlu0 %615 }
 0x1b7   : > { %v640_v11 = vsub.f32 %v1866_v17, %v616_v3 }
 0x1b9   : > { %v595_v31 = vpop.xlane.xlu1 %594  ;;  %v1919_v59 = vpop.eup %1295  ;;  %v667_v14 = vmul.f32 1.442695, %v640_v11 }
 0x1ba   : > { %v633_v15 = vsub.f32 %v1870_v16, %v595_v31  ;;  %v707_v18 = vsel %vm580_vm4, %v1919_v59, 0.0 }
 0x1bb   : > { %1299 = vpow2.f32 %v667_v14  ;;  %708 = vadd.xlane.f32.xlu0 %v707_v18 }
 0x1bc   : > { %v1924_v21 = vpop.eup %1297  ;;  %v653_v24 = vmul.f32 1.442695, %v633_v15 }
 0x1bd   : > { %v686_v58 = vsel %vm580_vm4, %v1924_v21, 0.0 }
 0x1be   : > { %1301 = vpow2.f32 %v653_v24  ;;  %687 = vadd.xlane.f32.xlu2 %v686_v58  ;;  %v619_v26 = vpop.xlane.xlu0 %618 }
 0x1bf   : > { %v641_v53 = vsub.f32 %v1874_v34, %v619_v26 }
 0x1c1   : > { %v598_v30 = vpop.xlane.xlu2 %597  ;;  %v1929_v37 = vpop.eup %1299  ;;  %v669_v36 = vmul.f32 1.442695, %v641_v53 }
 0x1c2   : > { %v634_v45 = vsub.f32 %v1878_v12, %v598_v30  ;;  %v710_v10 = vsel %vm580_vm4, %v1929_v37, 0.0 }
 0x1c3   : > { %1303 = vpow2.f32 %v669_v36  ;;  %711 = vadd.xlane.f32.xlu1 %v710_v10 }
 0x1c4   : > { %v1934_v32 = vpop.eup %1301  ;;  %v655_v33 = vmul.f32 1.442695, %v634_v45 }
 0x1c5   : > { %v689_v1 = vsel %vm580_vm4, %v1934_v32, 0.0 }
 0x1c6   : > { %1305 = vpow2.f32 %v655_v33  ;;  %690 = vadd.xlane.f32.xlu2 %v689_v1  ;;  %v622_v0 = vpop.xlane.xlu1 %621 }
 0x1c7   : > { %v642_v17 = vsub.f32 %v1882_v46, %v622_v0 }
 0x1c9   : > { %v601_v19 = vpop.xlane.xlu2 %600  ;;  %v1939_v16 = vpop.eup %1303  ;;  %v671_v25 = vmul.f32 1.442695, %v642_v17 }
 0x1ca   : > { %v635_v34 = vsub.f32 %v1886_v13, %v601_v19  ;;  %v713_v61 = vsel %vm580_vm4, %v1939_v16, 0.0 }
 0x1cb   : > { %1307 = vpow2.f32 %v671_v25  ;;  %714 = vadd.xlane.f32.xlu1 %v713_v61 }
 0x1cc   : > { %v1944_v12 = vpop.eup %1305  ;;  %v657_v35 = vmul.f32 1.442695, %v635_v34 }
 0x1cd   : > { %v692_v39 = vsel %vm580_vm4, %v1944_v12, 0.0 }
 0x1ce   : > { %1309 = vpow2.f32 %v657_v35  ;;  %693 = vadd.xlane.f32.xlu0 %v692_v39 }
 0x1d1   : > { %v604_v46 = vpop.xlane.xlu0 %603  ;;  %v1948_v6 = vpop.eup %1307 }
 0x1d2   : > { %v636_v41 = vsub.f32 %v1890_v5, %v604_v46  ;;  %v716_v13 = vsel %vm580_vm4, %v1948_v6, 0.0 }
 0x1d3   : > { %717 = vadd.xlane.f32.xlu2 %v716_v13 }
 0x1d4   : > { %v1953_v43 = vpop.eup %1309  ;;  %v659_v55 = vmul.f32 1.442695, %v636_v41 }
 0x1d5   : > { %v695_v44 = vsel %vm580_vm4, %v1953_v43, 0.0 }
 0x1d6   : > { %1311 = vpow2.f32 %v659_v55  ;;  %696 = vadd.xlane.f32.xlu0 %v695_v44 }
 0x1d9   : > { %v625_v23 = vpop.xlane.xlu0 %624 }
 0x1da   : > { %v643_v2 = vsub.f32 %v1894_v42, %v625_v23 }
 0x1dc   : > { %v1958_v48 = vpop.eup %1311  ;;  %v673_v49 = vmul.f32 1.442695, %v643_v2 }
 0x1dd   : > { %v698_v5 = vsel %vm580_vm4, %v1958_v48, 0.0 }
 0x1de   : > { %1313 = vpow2.f32 %v673_v49  ;;  %699 = vadd.xlane.f32.xlu1 %v698_v5 }
 0x1e1   : > { %v610_v51 = vpop.xlane.xlu0 %609 }
 0x1e2   : > { %v638_v54 = vsub.f32 %v1861_v38, %v610_v51 }
 0x1e4   : > { %v1963_v60 = vpop.eup %1313  ;;  %v663_v40 = vmul.f32 1.442695, %v638_v54 }
 0x1e5   : > { %v719_v63 = vsel %vm580_vm4, %v1963_v60, 0.0 }
 0x1e6   : > { %1315 = vpow2.f32 %v663_v40  ;;  %720 = vadd.xlane.f32.xlu2 %v719_v63 }
 0x1ec   : > { %v1967_v42 = vpop.eup %1315 }
 0x1ed   : > { %v704_v7 = vsel %vm580_vm4, %v1967_v42, 0.0 }
 0x1ee   : > { %705 = vadd.xlane.f32.xlu2 %v704_v7 }
 0x219   : > { %v679_v47 = vpop.xlane.xlu1 %678 }
 0x21a   : > { %1317 = vrcp.f32 %v679_v47 }
 0x220   : > { %v1318_v20 = vpop.eup %1317 }
 0x221   : > { %v741_v52 = vmul.f32 %v1318_v20, %v1900_v50  ;;  %v682_v38 = vpop.xlane.xlu2 %681  ;;  %v628_v28 = vpop.xlane.xlu1 %627 }
 0x222   : > { %1319 = vrcp.f32 %v682_v38  ;;  %v644_v8 = vsub.f32 %v1904_v22, %v628_v28 }
 0x223   : > { %v1215_v27 = vadd.f32 -0.0025, %v741_v52 }
 0x224   : > { %v675_v57 = vmul.f32 1.442695, %v644_v8 }
 0x225   : > { %v805_v62 = vand.u32 2147483647, %v1215_v27  ;;  %v773_v50 = vmax.f32 %v1215_v27, 0.0 }
 0x226   : > { %1321 = vpow2.f32 %v675_v57 }
 0x227   : > { %v821_v9 = vadd.f32 1e-12, %v805_v62  ;;  %v789_v53 = vmul.f32 %v773_v50, %v741_v52 }
 0x228   : > { %v1320_v3 = vpop.eup %1319 }
 0x229   : > { %v742_v11 = vmul.f32 %v1320_v3, %v1906_v56  ;;  %v607_v31 = vpop.xlane.xlu2 %606  ;;  %v685_v14 = vpop.xlane.xlu1 %684  ;;  %1323 = vrcp.f32 %v821_v9 }
 0x22a   : > { %v637_v15 = vsub.f32 %v1858_v4, %v607_v31  ;;  %1325 = vrcp.f32 %v685_v14 }
 0x22b   : > { %v1216_v18 = vadd.f32 -0.0025, %v742_v11 }
 0x22c   : > { %v1975_v24 = vpop.eup %1321  ;;  %v661_v58 = vmul.f32 1.442695, %v637_v15 }
 0x22d   : > { %v806_v22 = vand.u32 2147483647, %v1216_v18  ;;  %v722_v26 = vsel %vm580_vm4, %v1975_v24, 0.0  ;;  %v774_v0 = vmax.f32 %v1216_v18, 0.0 }
 0x22e   : > { %1327 = vpow2.f32 %v661_v58  ;;  %723 = vadd.xlane.f32.xlu0 %v722_v26  ;;  %v709_v56 = vpop.xlane.xlu0 %708 }
 0x22f   : > { %v1324_v30 = vpop.eup %1323  ;;  %v822_v36 = vadd.f32 1e-12, %v806_v22  ;;  %1329 = vrcp.f32 %v709_v56  ;;  %v790_v39 = vmul.f32 %v774_v0, %v742_v11 }
 0x230   : > { %v1326_v45 = vpop.eup %1325  ;;  %v1979_v10 = vmul.f32 %v1324_v30, %v789_v53 }
 0x231   : > { %v743_v4 = vmul.f32 %v1326_v45, %v1912_v29  ;;  %v688_v33 = vpop.xlane.xlu2 %687  ;;  %1331 = vrcp.f32 %v822_v36 }
 0x232   : > { %1333 = vrcp.f32 %v688_v33  ;;  %v869_v1 = vand.u32 2147483647, %v1979_v10 }
 0x233   : > { %v1217_v17 = vadd.f32 -0.0025, %v743_v4 }
 0x234   : > { %v1983_v19 = vpop.eup %1327  ;;  %v885_v25 = vsel %vm580_vm4, %v869_v1, 0.0 }
 0x235   : > { %v807_v34 = vand.u32 2147483647, %v1217_v17  ;;  %v701_v61 = vsel %vm580_vm4, %v1983_v19, 0.0  ;;  %v1330_v35 = vpop.eup %1329  ;;  %v775_v51 = vmax.f32 %v1217_v17, 0.0 }
 0x236   : > { %886 = vadd.xlane.f32.xlu0 %v885_v25  ;;  %702 = vadd.xlane.f32.xlu1 %v701_v61  ;;  %v751_v46 = vmul.f32 %v1330_v35, %v1919_v59  ;;  %v712_v41 = vpop.xlane.xlu1 %711 }
 0x237   : > { %v1332_v29 = vpop.eup %1331  ;;  %v823_v13 = vadd.f32 1e-12, %v807_v34  ;;  %1335 = vrcp.f32 %v712_v41  ;;  %v791_v20 = vmul.f32 %v775_v51, %v743_v4 }
 0x238   : > { %v1334_v55 = vpop.eup %1333  ;;  %v1989_v44 = vmul.f32 %v1332_v29, %v790_v39  ;;  %v1225_v23 = vadd.f32 -0.0025, %v751_v46 }
 0x239   : > { %v744_v2 = vmul.f32 %v1334_v55, %v1924_v21  ;;  %v691_v49 = vpop.xlane.xlu2 %690  ;;  %1337 = vrcp.f32 %v823_v13 }
 0x23a   : > { %1339 = vrcp.f32 %v691_v49  ;;  %v870_v5 = vand.u32 2147483647, %v1989_v44  ;;  %v815_v54 = vand.u32 2147483647, %v1225_v23  ;;  %v783_v57 = vmax.f32 %v1225_v23, 0.0 }
 0x23b   : > { %v1218_v40 = vadd.f32 -0.0025, %v744_v2 }
 0x23c   : > { %v888_v63 = vsel %vm580_vm4, %v870_v5, 0.0  ;;  %v831_v7 = vadd.f32 1e-12, %v815_v54  ;;  %v799_v50 = vmul.f32 %v783_v57, %v751_v46 }
 0x23d   : > { %v808_v59 = vand.u32 2147483647, %v1218_v40  ;;  %v1336_v47 = vpop.eup %1335  ;;  %v776_v31 = vmax.f32 %v1218_v40, 0.0 }
 0x23e   : > { %889 = vadd.xlane.f32.xlu1 %v888_v63  ;;  %v752_v38 = vmul.f32 %v1336_v47, %v1929_v37  ;;  %v715_v28 = vpop.xlane.xlu1 %714  ;;  %1341 = vrcp.f32 %v831_v7 }
 0x23f   : > { %v1338_v52 = vpop.eup %1337  ;;  %v824_v21 = vadd.f32 1e-12, %v808_v59  ;;  %1343 = vrcp.f32 %v715_v28  ;;  %v792_v30 = vmul.f32 %v776_v31, %v744_v2 }
 0x240   : > { %v1340_v8 = vpop.eup %1339  ;;  %v1995_v27 = vmul.f32 %v1338_v52, %v791_v20  ;;  %v1226_v62 = vadd.f32 -0.0025, %v752_v38 }
 0x241   : > { %v745_v9 = vmul.f32 %v1340_v8, %v1934_v32  ;;  %v694_v3 = vpop.xlane.xlu0 %693  ;;  %1345 = vrcp.f32 %v824_v21 }
 0x242   : > { %1347 = vrcp.f32 %v694_v3  ;;  %v871_v11 = vand.u32 2147483647, %v1995_v27  ;;  %v816_v14 = vand.u32 2147483647, %v1226_v62  ;;  %v784_v0 = vmax.f32 %v1226_v62, 0.0 }
 0x243   : > { %v1219_v15 = vadd.f32 -0.0025, %v745_v9 }
 0x244   : > { %v891_v37 = vsel %vm580_vm4, %v871_v11, 0.0  ;;  %v1342_v18 = vpop.eup %1341  ;;  %v832_v22 = vadd.f32 1e-12, %v816_v14  ;;  %v800_v41 = vmul.f32 %v784_v0, %v752_v38 }
 0x245   : > { %v809_v58 = vand.u32 2147483647, %v1219_v15  ;;  %892 = vadd.xlane.f32.xlu2 %v891_v37  ;;  %v1344_v26 = vpop.eup %1343  ;;  %v2000_v53 = vmul.f32 %v1342_v18, %v799_v50  ;;  %v777_v35 = vmax.f32 %v1219_v15, 0.0 }
 0x246   : > { %v753_v56 = vmul.f32 %v1344_v26, %v1939_v16  ;;  %v718_v36 = vpop.xlane.xlu2 %717  ;;  %1349 = vrcp.f32 %v832_v22 }
 0x247   : > { %v1346_v32 = vpop.eup %1345  ;;  %v825_v45 = vadd.f32 1e-12, %v809_v58  ;;  %1351 = vrcp.f32 %v718_v36  ;;  %v879_v33 = vand.u32 2147483647, %v2000_v53  ;;  %v793_v49 = vmul.f32 %v777_v35, %v745_v9 }
 0x248   : > { %v1348_v4 = vpop.eup %1347  ;;  %v2004_v1 = vmul.f32 %v1346_v32, %v792_v30  ;;  %v1227_v17 = vadd.f32 -0.0025, %v753_v56 }
 0x249   : > { %v746_v25 = vmul.f32 %v1348_v4, %v1944_v12  ;;  %v697_v34 = vpop.xlane.xlu0 %696  ;;  %1353 = vrcp.f32 %v825_v45  ;;  %v915_v61 = vsel %vm580_vm4, %v879_v33, 0.0 }
 0x24a   : > { %1355 = vrcp.f32 %v697_v34  ;;  %v872_v16 = vand.u32 2147483647, %v2004_v1  ;;  %v817_v39 = vand.u32 2147483647, %v1227_v17  ;;  %916 = vadd.xlane.f32.xlu1 %v915_v61  ;;  %v785_v7 = vmax.f32 %v1227_v17, 0.0 }
 0x24b   : > { %v1220_v29 = vadd.f32 -0.0025, %v746_v25 }
 0x24c   : > { %v894_v46 = vsel %vm580_vm4, %v872_v16, 0.0  ;;  %v1350_v13 = vpop.eup %1349  ;;  %v833_v23 = vadd.f32 1e-12, %v817_v39  ;;  %v801_v62 = vmul.f32 %v785_v7, %v753_v56 }
 0x24d   : > { %v810_v55 = vand.u32 2147483647, %v1220_v29  ;;  %895 = vadd.xlane.f32.xlu0 %v894_v46  ;;  %v1352_v2 = vpop.eup %1351  ;;  %v2010_v12 = vmul.f32 %v1350_v13, %v800_v41  ;;  %v778_v21 = vmax.f32 %v1220_v29, 0.0 }
 0x24e   : > { %v754_v51 = vmul.f32 %v1352_v2, %v1948_v6  ;;  %1357 = vrcp.f32 %v833_v23 }
 0x24f   : > { %v1354_v5 = vpop.eup %1353  ;;  %v826_v54 = vadd.f32 1e-12, %v810_v55  ;;  %v880_v63 = vand.u32 2147483647, %v2010_v12 }
 0x250   : > { %v1356_v40 = vpop.eup %1355  ;;  %v2014_v59 = vmul.f32 %v1354_v5, %v793_v49  ;;  %v1228_v47 = vadd.f32 -0.0025, %v754_v51 }
 0x251   : > { %v747_v20 = vmul.f32 %v1356_v40, %v1953_v43  ;;  %v700_v52 = vpop.xlane.xlu1 %699  ;;  %1359 = vrcp.f32 %v826_v54  ;;  %v918_v38 = vsel %vm580_vm4, %v880_v63, 0.0  ;;  %v794_v43 = vmul.f32 %v778_v21, %v746_v25 }
 0x252   : > { %1361 = vrcp.f32 %v700_v52  ;;  %v873_v28 = vand.u32 2147483647, %v2014_v59  ;;  %v818_v6 = vand.u32 2147483647, %v1228_v47  ;;  %919 = vadd.xlane.f32.xlu2 %v918_v38  ;;  %v786_v58 = vmax.f32 %v1228_v47, 0.0 }
 0x253   : > { %v1221_v8 = vadd.f32 -0.0025, %v747_v20 }
 0x254   : > { %v897_v57 = vsel %vm580_vm4, %v873_v28, 0.0  ;;  %v1358_v9 = vpop.eup %1357  ;;  %v834_v11 = vadd.f32 1e-12, %v818_v6  ;;  %v802_v4 = vmul.f32 %v786_v58, %v754_v51 }
 0x255   : > { %v811_v3 = vand.u32 2147483647, %v1221_v8  ;;  %898 = vadd.xlane.f32.xlu0 %v897_v57  ;;  %v2020_v31 = vmul.f32 %v1358_v9, %v801_v62  ;;  %v779_v56 = vmax.f32 %v1221_v8, 0.0 }
 0x256   : > { %1363 = vrcp.f32 %v834_v11 }
 0x257   : > { %v1360_v14 = vpop.eup %1359  ;;  %v827_v15 = vadd.f32 1e-12, %v811_v3  ;;  %v881_v50 = vand.u32 2147483647, %v2020_v31  ;;  %v795_v25 = vmul.f32 %v779_v56, %v747_v20 }
 0x258   : > { %v1362_v37 = vpop.eup %1361  ;;  %v2023_v18 = vmul.f32 %v1360_v14, %v794_v43  ;;  %v1246_v14 = vld [vmem:[%s2168_s1] sm:$0xff] }
 0x259   : > { %v748_v22 = vmul.f32 %v1362_v37, %v1958_v48  ;;  %v721_v26 = vpop.xlane.xlu2 %720  ;;  %1365 = vrcp.f32 %v827_v15  ;;  %v921_v30 = vsel %vm580_vm4, %v881_v50, 0.0  ;;  %1028 = vmatpush.bf16.msra.mxu1 %v1246_v14  ;;  %1248 = vmatpush.bf16.msra.mxu3 %v1246_v14 }
 0x25a   : > { %1367 = vrcp.f32 %v721_v26  ;;  %v874_v32 = vand.u32 2147483647, %v2023_v18  ;;  %922 = vadd.xlane.f32.xlu2 %v921_v30 }
 0x25b   : > { %v1222_v36 = vadd.f32 -0.0025, %v748_v22 }
 0x25c   : > { %v900_v45 = vsel %vm580_vm4, %v874_v32, 0.0  ;;  %v1364_v33 = vpop.eup %1363 }
 0x25d   : > { %v812_v0 = vand.u32 2147483647, %v1222_v36  ;;  %901 = vadd.xlane.f32.xlu1 %v900_v45  ;;  %v2029_v17 = vmul.f32 %v1364_v33, %v802_v4  ;;  %v780_v13 = vmax.f32 %v1222_v36, 0.0 }
 0x25f   : > { %v1366_v48 = vpop.eup %1365  ;;  %v828_v34 = vadd.f32 1e-12, %v812_v0  ;;  %v882_v16 = vand.u32 2147483647, %v2029_v17  ;;  %v796_v49 = vmul.f32 %v780_v13, %v748_v22 }
 0x260   : > { %v1368_v61 = vpop.eup %1367  ;;  %v2032_v35 = vmul.f32 %v1366_v48, %v795_v25 }
 0x261   : > { %v755_v39 = vmul.f32 %v1368_v61, %v1963_v60  ;;  %v706_v29 = vpop.xlane.xlu2 %705  ;;  %1369 = vrcp.f32 %v828_v34  ;;  %v924_v46 = vsel %vm580_vm4, %v882_v16, 0.0 }
 0x262   : > { %1371 = vrcp.f32 %v706_v29  ;;  %v875_v41 = vand.u32 2147483647, %v2032_v35  ;;  %925 = vadd.xlane.f32.xlu0 %v924_v46 }
 0x263   : > { %v1229_v55 = vadd.f32 -0.0025, %v755_v39 }
 0x264   : > { %v903_v23 = vsel %vm580_vm4, %v875_v41, 0.0 }
 0x265   : > { %v819_v2 = vand.u32 2147483647, %v1229_v55  ;;  %904 = vadd.xlane.f32.xlu1 %v903_v23  ;;  %v787_v7 = vmax.f32 %v1229_v55, 0.0 }
 0x267   : > { %v1370_v5 = vpop.eup %1369  ;;  %v835_v51 = vadd.f32 1e-12, %v819_v2  ;;  %v803_v38 = vmul.f32 %v787_v7, %v755_v39 }
 0x268   : > { %v1372_v54 = vpop.eup %1371  ;;  %v2038_v40 = vmul.f32 %v1370_v5, %v796_v49 }
 0x269   : > { %v750_v60 = vmul.f32 %v1372_v54, %v1967_v42  ;;  %1373 = vrcp.f32 %v835_v51 }
 0x26a   : > { %v876_v63 = vand.u32 2147483647, %v2038_v40 }
 0x26b   : > { %v1224_v47 = vadd.f32 -0.0025, %v750_v60 }
 0x26c   : > { %v906_v20 = vsel %vm580_vm4, %v876_v63, 0.0 }
 0x26d   : > { %v814_v52 = vand.u32 2147483647, %v1224_v47  ;;  %907 = vadd.xlane.f32.xlu2 %v906_v20  ;;  %v782_v57 = vmax.f32 %v1224_v47, 0.0 }
 0x26f   : > { %v1374_v28 = vpop.eup %1373  ;;  %v830_v21 = vadd.f32 1e-12, %v814_v52  ;;  %v798_v62 = vmul.f32 %v782_v57, %v750_v60 }
 0x270   : > { %v2043_v6 = vmul.f32 %v1374_v28, %v803_v38 }
 0x271   : > { %1375 = vrcp.f32 %v830_v21 }
 0x272   : > { %v883_v8 = vand.u32 2147483647, %v2043_v6 }
 0x274   : > { %v927_v42 = vsel %vm580_vm4, %v883_v8, 0.0 }
 0x275   : > { %928 = vadd.xlane.f32.xlu0 %v927_v42 }
 0x277   : > { %v1376_v9 = vpop.eup %1375 }
 0x278   : > { %v2047_v3 = vmul.f32 %v1376_v9, %v798_v62 }
 0x27a   : > { %v878_v11 = vand.u32 2147483647, %v2047_v3 }
 0x27c   : > { %v912_v43 = vsel %vm580_vm4, %v878_v11, 0.0 }
 0x27d   : > { %913 = vadd.xlane.f32.xlu0 %v912_v43 }
 0x2a1   : > { %v724_v15 = vpop.xlane.xlu0 %723 }
 0x2a2   : > { %1377 = vrcp.f32 %v724_v15 }
 0x2a8   : > { %v1378_v37 = vpop.eup %1377 }
 0x2a9   : > { %v756_v50 = vmul.f32 %v1378_v37, %v1975_v24  ;;  %v703_v58 = vpop.xlane.xlu1 %702  ;;  %v887_v22 = vpop.xlane.xlu0 %886 }
 0x2aa   : > { %1379 = vrcp.f32 %v703_v58  ;;  %v933_v26 = vmax.f32 %v887_v22, 1e-12 }
 0x2ab   : > { %v1230_v30 = vadd.f32 -0.0025, %v756_v50 }
 0x2ac   : > { %1381 = vrcp.f32 %v933_v26 }
 0x2ad   : > { %v820_v32 = vand.u32 2147483647, %v1230_v30  ;;  %v788_v0 = vmax.f32 %v1230_v30, 0.0 }
 0x2af   : > { %v836_v56 = vadd.f32 1e-12, %v820_v32 }
 0x2b0   : > { %v1380_v36 = vpop.eup %1379 }
 0x2b1   : > { %v749_v45 = vmul.f32 %v1380_v36, %v1983_v19  ;;  %v890_v4 = vpop.xlane.xlu1 %889  ;;  %1383 = vrcp.f32 %v836_v56  ;;  %v804_v19 = vmul.f32 %v788_v0, %v756_v50 }
 0x2b2   : > { %v1382_v33 = vpop.eup %1381  ;;  %v934_v24 = vmax.f32 %v890_v4, 1e-12 }
 0x2b3   : > { %v1223_v25 = vadd.f32 -0.0025, %v749_v45  ;;  %v965_v48 = vmul.f32 %v1382_v33, %v1979_v10 }
 0x2b4   : > { %1385 = vrcp.f32 %v934_v24 }
 0x2b5   : > { %v813_v34 = vand.u32 2147483647, %v1223_v25  ;;  %1086 = vst.msk [vmem:[%s2060_s28] sm:$0xff] %vm580_vm4, %v965_v48  ;;  %v781_v55 = vmax.f32 %v1223_v25, 0.0 }
 0x2b7   : > { %v1384_v61 = vpop.eup %1383  ;;  %v829_v16 = vadd.f32 1e-12, %v813_v34  ;;  %v797_v5 = vmul.f32 %v781_v55, %v749_v45 }
 0x2b8   : > { %v893_v39 = vpop.xlane.xlu2 %892  ;;  %v2065_v29 = vmul.f32 %v1384_v61, %v804_v19 }
 0x2b9   : > { %v935_v46 = vmax.f32 %v893_v39, 1e-12  ;;  %1387 = vrcp.f32 %v829_v16 }
 0x2ba   : > { %v1386_v41 = vpop.eup %1385  ;;  %v884_v13 = vand.u32 2147483647, %v2065_v29 }
 0x2bb   : > { %1389 = vrcp.f32 %v935_v46  ;;  %v966_v10 = vmul.f32 %v1386_v41, %v1989_v44 }
 0x2bc   : > { %v930_v23 = vsel %vm580_vm4, %v884_v13, 0.0 }
 0x2bd   : > { %931 = vadd.xlane.f32.xlu1 %v930_v23  ;;  %v981_v2 = vpack.c.bf16 %v966_v10, %v965_v48  ;;  %1087 = vst.msk [vmem:[%s2060_s28 + $0x8] sm:$0xff] %vm580_vm4, %v966_v10  ;;  %v917_v49 = vpop.xlane.xlu1 %916 }
 0x2be   : > { %v943_v54 = vmax.f32 %v917_v49, 1e-12 }
 0x2bf   : > { %v1388_v51 = vpop.eup %1387  ;;  %1235 = vmatmul.msk.bf16.vlgmr.msra.gmra.mxu1 %vm580_vm4, %v981_v2 }
 0x2c0   : > { %v896_v60 = vpop.xlane.xlu0 %895  ;;  %v2073_v63 = vmul.f32 %v1388_v51, %v797_v5  ;;  %1391 = vrcp.f32 %v943_v54 }
 0x2c1   : > { %v1390_v7 = vpop.eup %1389  ;;  %v936_v47 = vmax.f32 %v896_v60, 1e-12 }
 0x2c2   : > { %v877_v44 = vand.u32 2147483647, %v2073_v63  ;;  %v967_v20 = vmul.f32 %v1390_v7, %v1995_v27 }
 0x2c3   : > { %1393 = vrcp.f32 %v936_v47 }
 0x2c4   : > { %v909_v52 = vsel %vm580_vm4, %v877_v44, 0.0  ;;  %1088 = vst.msk [vmem:[%s2060_s28 + $0x10] sm:$0xff] %vm580_vm4, %v967_v20 }
 0x2c5   : > { %910 = vadd.xlane.f32.xlu2 %v909_v52  ;;  %v920_v38 = vpop.xlane.xlu2 %919 }
 0x2c6   : > { %v1392_v28 = vpop.eup %1391  ;;  %v944_v21 = vmax.f32 %v920_v38, 1e-12 }
 0x2c7   : > { %v975_v57 = vmul.f32 %v1392_v28, %v2000_v53 }
 0x2c8   : > { %v899_v8 = vpop.xlane.xlu0 %898  ;;  %1395 = vrcp.f32 %v944_v21 }
 0x2c9   : > { %v1394_v42 = vpop.eup %1393  ;;  %v937_v62 = vmax.f32 %v899_v8, 1e-12  ;;  %1096 = vst.msk [vmem:[%s2060_s28 + $0x50] sm:$0xff] %vm580_vm4, %v975_v57 }
 0x2ca   : > { %v968_v9 = vmul.f32 %v1394_v42, %v2004_v1 }
 0x2cb   : > { %1397 = vrcp.f32 %v937_v62 }
 0x2cc   : > { %v982_v27 = vpack.c.bf16 %v968_v9, %v967_v20  ;;  %1089 = vst.msk [vmem:[%s2060_s28 + $0x18] sm:$0xff] %vm580_vm4, %v968_v9 }
 0x2cd   : > { %v923_v11 = vpop.xlane.xlu2 %922 }
 0x2ce   : > { %v1396_v43 = vpop.eup %1395  ;;  %v945_v14 = vmax.f32 %v923_v11, 1e-12 }
 0x2cf   : > { %1236 = vmatmul.msk.bf16.gmra.mxu1 %vm580_vm4, %v982_v27  ;;  %v976_v53 = vmul.f32 %v1396_v43, %v2010_v12 }
 0x2d0   : > { %v902_v15 = vpop.xlane.xlu1 %901  ;;  %1399 = vrcp.f32 %v945_v14 }
 0x2d1   : > { %v1398_v37 = vpop.eup %1397  ;;  %v938_v50 = vmax.f32 %v902_v15, 1e-12  ;;  %v986_v1 = vpack.c.bf16 %v976_v53, %v975_v57  ;;  %1097 = vst.msk [vmem:[%s2060_s28 + $0x58] sm:$0xff] %vm580_vm4, %v976_v53 }
 0x2d2   : > { %v969_v58 = vmul.f32 %v1398_v37, %v2014_v59 }
 0x2d3   : > { %1401 = vrcp.f32 %v938_v50  ;;  %1240 = vmatmul.msk.bf16.vlgmr.msra.gmra.mxu3 %vm580_vm4, %v986_v1 }
 0x2d4   : > { %1090 = vst.msk [vmem:[%s2060_s28 + $0x20] sm:$0xff] %vm580_vm4, %v969_v58 }
 0x2d5   : > { %v926_v22 = vpop.xlane.xlu0 %925 }
 0x2d6   : > { %v1400_v26 = vpop.eup %1399  ;;  %v946_v30 = vmax.f32 %v926_v22, 1e-12 }
 0x2d7   : > { %v977_v12 = vmul.f32 %v1400_v26, %v2020_v31 }
 0x2d8   : > { %v905_v32 = vpop.xlane.xlu1 %904  ;;  %1403 = vrcp.f32 %v946_v30 }
 0x2d9   : > { %v1402_v56 = vpop.eup %1401  ;;  %v939_v36 = vmax.f32 %v905_v32, 1e-12  ;;  %1098 = vst.msk [vmem:[%s2060_s28 + $0x60] sm:$0xff] %vm580_vm4, %v977_v12 }
 0x2da   : > { %v970_v45 = vmul.f32 %v1402_v56, %v2023_v18 }
 0x2db   : > { %1405 = vrcp.f32 %v939_v36 }
 0x2dc   : > { %v983_v59 = vpack.c.bf16 %v970_v45, %v969_v58  ;;  %1091 = vst.msk [vmem:[%s2060_s28 + $0x28] sm:$0xff] %vm580_vm4, %v970_v45 }
 0x2de   : > { %v1404_v4 = vpop.eup %1403 }
 0x2df   : > { %1237 = vmatmul.msk.bf16.gmra.mxu1 %vm580_vm4, %v983_v59  ;;  %v978_v31 = vmul.f32 %v1404_v4, %v2029_v17 }
 0x2e0   : > { %v908_v33 = vpop.xlane.xlu2 %907 }
 0x2e1   : > { %v1406_v24 = vpop.eup %1405  ;;  %v940_v0 = vmax.f32 %v908_v33, 1e-12  ;;  %v987_v25 = vpack.c.bf16 %v978_v31, %v977_v12  ;;  %1099 = vst.msk [vmem:[%s2060_s28 + $0x68] sm:$0xff] %vm580_vm4, %v978_v31 }
 0x2e2   : > { %v971_v18 = vmul.f32 %v1406_v24, %v2032_v35 }
 0x2e3   : > { %1407 = vrcp.f32 %v940_v0  ;;  %1241 = vmatmul.msk.bf16.gmra.mxu3 %vm580_vm4, %v987_v25 }
 0x2e4   : > { %1092 = vst.msk [vmem:[%s2060_s28 + $0x30] sm:$0xff] %vm580_vm4, %v971_v18 }
 0x2e8   : > { %v929_v48 = vpop.xlane.xlu0 %928 }
 0x2e9   : > { %v1408_v34 = vpop.eup %1407  ;;  %v947_v19 = vmax.f32 %v929_v48, 1e-12 }
 0x2ea   : > { %v972_v61 = vmul.f32 %v1408_v34, %v2038_v40 }
 0x2eb   : > { %1409 = vrcp.f32 %v947_v19 }
 0x2ec   : > { %v984_v17 = vpack.c.bf16 %v972_v61, %v971_v18  ;;  %1093 = vst.msk [vmem:[%s2060_s28 + $0x38] sm:$0xff] %vm580_vm4, %v972_v61 }
 0x2ef   : > { %1238 = vmatmul.msk.bf16.gmra.mxu1 %vm580_vm4, %v984_v17 }
 0x2f0   : > { %v914_v35 = vpop.xlane.xlu0 %913 }
 0x2f1   : > { %v1410_v16 = vpop.eup %1409  ;;  %v942_v39 = vmax.f32 %v914_v35, 1e-12 }
 0x2f2   : > { %v979_v46 = vmul.f32 %v1410_v16, %v2043_v6 }
 0x2f3   : > { %1411 = vrcp.f32 %v942_v39 }
 0x2f4   : > { %1100 = vst.msk [vmem:[%s2060_s28 + $0x70] sm:$0xff] %vm580_vm4, %v979_v46 }
 0x2f9   : > { %v1412_v41 = vpop.eup %1411 }
 0x2fa   : > { %v974_v13 = vmul.f32 %v1412_v41, %v2047_v3 }
 0x2fc   : > { %1095 = vst.msk [vmem:[%s2060_s28 + $0x48] sm:$0xff] %vm580_vm4, %v974_v13 }
 0x330   : > { %v932_v40 = vpop.xlane.xlu1 %931 }
 0x331   : > { %v948_v55 = vmax.f32 %v932_v40, 1e-12 }
 0x333   : > { %1413 = vrcp.f32 %v948_v55 }
 0x338   : > { %v911_v10 = vpop.xlane.xlu2 %910 }
 0x339   : > { %v1414_v23 = vpop.eup %1413  ;;  %v941_v2 = vmax.f32 %v911_v10, 1e-12 }
 0x33a   : > { %v980_v6 = vmul.f32 %v1414_v23, %v2065_v29 }
 0x33b   : > { %1415 = vrcp.f32 %v941_v2 }
 0x33c   : > { %v1030_v3 = vpop.f32.mrf.mxu1  ;;  %v988_v49 = vpack.c.bf16 %v980_v6, %v979_v46  ;;  %1101 = vst.msk [vmem:[%s2060_s28 + $0x78] sm:$0xff] %vm580_vm4, %v980_v6 }
 0x33d   : > { %1070 = vst.msk [vmem:[%s2122_s5] sm:$0xff] %vm248_vm0, %v1030_v3 }
 0x33e   : > { %1242 = vmatmul.msk.bf16.gmra.mxu3 %vm580_vm4, %v988_v49 }
 0x341   : > { %v1416_v5 = vpop.eup %1415 }
 0x342   : > { %v973_v51 = vmul.f32 %v1416_v5, %v2073_v63 }
 0x344   : > { %v1032_v54 = vpop.f32.mrf.mxu1  ;;  %v985_v60 = vpack.c.bf16 %v974_v13, %v973_v51  ;;  %1094 = vst.msk [vmem:[%s2060_s28 + $0x40] sm:$0xff] %vm580_vm4, %v973_v51 }
 0x345   : > { %1071 = vst.msk [vmem:[%s2122_s5 + $0x8] sm:$0xff] %vm248_vm0, %v1032_v54 }
 0x346   : > { %1239 = vmatmul.msk.bf16.gmra.mxu1 %vm580_vm4, %v985_v60 }
 0x34c   : > { %v1035_v29 = vpop.f32.mrf.mxu1 }
 0x34d   : > { %1072 = vst.msk [vmem:[%s2122_s5 + $0x10] sm:$0xff] %vm248_vm0, %v1035_v29 }
 0x354   : > { %v1037_v7 = vpop.f32.mrf.mxu1 }
 0x355   : > { %1073 = vst.msk [vmem:[%s2122_s5 + $0x18] sm:$0xff] %vm248_vm0, %v1037_v7 }
 0x356   : > { %v1055_v63 = vpop.f32.mrf.mxu3 }
 0x357   : > { %1080 = vst.msk [vmem:[%s2122_s5 + $0x50] sm:$0xff] %vm248_vm0, %v1055_v63 }
 0x35c   : > { %v1040_v47 = vpop.f32.mrf.mxu1 }
 0x35d   : > { %1074 = vst.msk [vmem:[%s2122_s5 + $0x20] sm:$0xff] %vm248_vm0, %v1040_v47 }
 0x35e   : > { %v1057_v44 = vpop.f32.mrf.mxu3 }
 0x35f   : > { %1081 = vst.msk [vmem:[%s2122_s5 + $0x58] sm:$0xff] %vm248_vm0, %v1057_v44 }
 0x364   : > { %v1042_v20 = vpop.f32.mrf.mxu1 }
 0x365   : > { %1075 = vst.msk [vmem:[%s2122_s5 + $0x28] sm:$0xff] %vm248_vm0, %v1042_v20 }
 0x366   : > { %v1060_v52 = vpop.f32.mrf.mxu3 }
 0x367   : > { %1082 = vst.msk [vmem:[%s2122_s5 + $0x60] sm:$0xff] %vm248_vm0, %v1060_v52 }
 0x36c   : > { %v1045_v38 = vpop.f32.mrf.mxu1 }
 0x36d   : > { %1076 = vst.msk [vmem:[%s2122_s5 + $0x30] sm:$0xff] %vm248_vm0, %v1045_v38 }
 0x36e   : > { %v1062_v28 = vpop.f32.mrf.mxu3 }
 0x36f   : > { %1083 = vst.msk [vmem:[%s2122_s5 + $0x68] sm:$0xff] %vm248_vm0, %v1062_v28 }
 0x374   : > { %v1047_v21 = vpop.f32.mrf.mxu1 }
 0x375   : > { %1077 = vst.msk [vmem:[%s2122_s5 + $0x38] sm:$0xff] %vm248_vm0, %v1047_v21 }
 0x3c1   : > { %v1065_v8 = vpop.f32.mrf.mxu3 }
 0x3c2   : > { %1084 = vst.msk [vmem:[%s2122_s5 + $0x70] sm:$0xff] %vm248_vm0, %v1065_v8 }
 0x3c3   : > { %v1050_v57 = vpop.f32.mrf.mxu1 }
 0x3c4   : > { %1078 = vst.msk [vmem:[%s2122_s5 + $0x40] sm:$0xff] %vm248_vm0, %v1050_v57 }
 0x3c9   : > { %v1067_v42 = vpop.f32.mrf.mxu3 }
 0x3ca   : > { %1085 = vst.msk [vmem:[%s2122_s5 + $0x78] sm:$0xff] %vm248_vm0, %v1067_v42 }
 0x3cb   : > { %v1052_v62 = vpop.f32.mrf.mxu1 }
 0x3cc   : > { %1079 = vst.msk [vmem:[%s2122_s5 + $0x48] sm:$0xff] %vm248_vm0, %v1052_v62 }
 0x3cd PF: > { %s15_s15 = sadd.s32 1, %s1423_s15  }
 0x3ce   : > { %p12_p4 = scmp.ge.s32.totalorder %s15_s15, 6  }
 0x3d0   :  { %14 = sbr.rel (!%p12_p4) target bundleno = 1 (0x1), region = 74 }

</bundles_post_ra>
